<compile_context>
chip_gen: v5e
topology: v5e:2x2
jax: 0.10.0
libtpu: 0.0.40
codegen_flags: <defaults>
</compile_context>

<pallas_src>
import math

import jax
import jax.numpy as jnp
from jax import lax
from jax.experimental import pallas as pl
from jax.experimental.pallas import tpu as pltpu


NEG_INF = -1e30  # large finite negative: safe in f32 and bf16, no NaN from -inf - -inf


# ---------------------------------------------------------------------------
# Tiled linear layer  y = x @ W + b   (used for the QKV and output projections)
# ---------------------------------------------------------------------------
def _linear_kernel(x_ref, w_ref, b_ref, o_ref):
    acc = jnp.dot(x_ref[...], w_ref[...], preferred_element_type=jnp.float32)
    o_ref[...] = (acc + b_ref[...]).astype(o_ref.dtype)


def _pick_tile(full, target, align):
    """Largest tile <= target that divides `full` and respects the (8,128) rule."""
    t = math.gcd(target, full)
    if t < full and t % align != 0:
        t = full                      # fall back to the untiled (full) dimension
    return t


def _compiler_params(dimension_semantics, working_set_bytes):
    kwargs = dict(dimension_semantics=dimension_semantics)
    # Raise the scoped-VMEM ceiling only when the working set actually needs it
    # (v5e default ~16 MiB scoped, v6e/v7x ~32 MiB; v7x physical is 64 MiB).
    if working_set_bytes > 12 * 1024 * 1024:
        kwargs["vmem_limit_bytes"] = int(min(64 * 1024 * 1024,
                                             max(32 * 1024 * 1024,
                                                 2 * working_set_bytes)))
    return pltpu.CompilerParams(**kwargs)


def _linear(x2d, w, b, out_dtype):
    rows, cin = x2d.shape
    cout = w.shape[1]
    tm = _pick_tile(rows, 256, 8)
    tn = _pick_tile(cout, 1536, 128)
    # rows innermost: the weight block stays resident while x streams through,
    # so W is DMA'd once per column tile instead of once per row tile.
    grid = (cout // tn, rows // tm)

    out_isz = jnp.dtype(out_dtype).itemsize
    ws = 2 * (tm * cin * x2d.dtype.itemsize + cin * tn * w.dtype.itemsize
              + tn * 4 + tm * tn * out_isz)
    cost = pl.CostEstimate(
        flops=2 * rows * cin * cout,
        transcendentals=0,
        bytes_accessed=(rows * cin * x2d.dtype.itemsize
                        + cin * cout * w.dtype.itemsize
                        + rows * cout * out_isz))

    return pl.pallas_call(
        _linear_kernel,
        out_shape=jax.ShapeDtypeStruct((rows, cout), out_dtype),
        grid_spec=pltpu.PrefetchScalarGridSpec(
            num_scalar_prefetch=0,
            grid=grid,
            in_specs=[
                pl.BlockSpec((tm, cin), lambda j, i: (i, 0)),   # activations
                pl.BlockSpec((cin, tn), lambda j, i: (0, j)),   # weight (2-D, unpadded)
                pl.BlockSpec((1, tn), lambda j, i: (0, j)),     # bias
            ],
            out_specs=pl.BlockSpec((tm, tn), lambda j, i: (i, j)),
        ),
        compiler_params=_compiler_params(("parallel", "parallel"), ws),
        cost_estimate=cost,
    )(x2d, w, b)


# ---------------------------------------------------------------------------
# Flash attention over pre-projected q/k/v in (B, H, T, D) layout
# ---------------------------------------------------------------------------
def _make_flash_kernel(q_block, kv_block, bf16_exp):
    def kernel(q_ref, k_ref, v_ref, o_ref, m_scr, l_scr, acc_scr):
        qi = pl.program_id(1)
        ki = pl.program_id(2)
        nk = pl.num_programs(2)
        q_start = qi * q_block
        k_start = ki * kv_block
        q_end = q_start + (q_block - 1)
        k_end = k_start + (kv_block - 1)

        @pl.when(ki == 0)
        def _():
            m_scr[...] = jnp.full(m_scr.shape, NEG_INF, m_scr.dtype)
            l_scr[...] = jnp.zeros(l_scr.shape, l_scr.dtype)
            acc_scr[...] = jnp.zeros(acc_scr.shape, acc_scr.dtype)

        def update(apply_mask):
            q = q_ref[0]                       # (H, Tq, D) bf16 (scale pre-folded)
            k = k_ref[0]                       # (H, Tk, D) bf16
            v = v_ref[0]                       # (H, Tk, D) bf16
            s = jnp.einsum('hqd,hkd->hqk', q, k,
                           preferred_element_type=jnp.float32)   # (H,Tq,Tk) f32
            if apply_mask:                     # only on diagonal-straddling tiles
                rows = q_start + lax.broadcasted_iota(
                    jnp.int32, (q_block, kv_block), 0)
                cols = k_start + lax.broadcasted_iota(
                    jnp.int32, (q_block, kv_block), 1)
                s = jnp.where((rows >= cols)[None, :, :], s, NEG_INF)

            m_prev = m_scr[...]                                   # (H, Tq)
            m_new = jnp.maximum(m_prev, s.max(axis=-1))           # (H, Tq)
            alpha = jnp.exp(m_prev - m_new)                       # (H, Tq)
            su = s - m_new[:, :, None]
            if bf16_exp:                       # v6e/v7x: bf16 EUP doubles exp rate
                p = jnp.exp(su.astype(jnp.bfloat16))
                p_sum = p.astype(jnp.float32).sum(axis=-1)
            else:
                p = jnp.exp(su)
                p_sum = p.sum(axis=-1)
            l_scr[...] = alpha * l_scr[...] + p_sum
            acc_scr[...] = (alpha[:, :, None] * acc_scr[...]
                            + jnp.einsum('hqk,hkd->hqd', p.astype(jnp.bfloat16), v,
                                         preferred_element_type=jnp.float32))
            m_scr[...] = m_new

        # interior tile: every key causally visible -> no iota / compare / select
        @pl.when(k_end <= q_start)
        def _():
            update(apply_mask=False)

        # diagonal-straddling tile: build & apply the causal mask
        @pl.when(jnp.logical_and(k_start <= q_end, k_end > q_start))
        def _():
            update(apply_mask=True)

        # epilogue: deferred normalization on the (H, Tq, D) accumulator
        @pl.when(ki == nk - 1)
        def _():
            inv_l = pl.reciprocal(l_scr[...], approx=True)        # (H, Tq), EUP slot
            o_ref[0] = (acc_scr[...] * inv_l[:, :, None]).astype(o_ref.dtype)

    return kernel


def _flash_attention(q, k, v, *, q_block, kv_block, bf16_exp=False):
    B, H, T, D = q.shape
    assert T % q_block == 0 and T % kv_block == 0
    grid = (B, T // q_block, T // kv_block)

    def q_index(b, qi, ki):
        return (b, 0, qi, 0)

    def kv_index(b, qi, ki):
        # Clamp kv tiles strictly above the causal diagonal to the last valid
        # block: pl.when already skips the compute; this also suppresses the DMA.
        last_valid = ((qi + 1) * q_block - 1) // kv_block
        return (b, 0, jnp.minimum(ki, last_valid), 0)

    ws = (2 * (3 * kv_block + q_block) * H * D * 2          # double-buffered q/k/v/out
          + H * q_block * (D + 2) * 4                       # acc / m / l scratch
          + 3 * H * q_block * kv_block * 4)                 # s / p temporaries
    cost = pl.CostEstimate(
        flops=4 * B * H * T * T * D,
        transcendentals=B * H * T * T,
        bytes_accessed=4 * B * H * T * D * q.dtype.itemsize)

    kernel = _make_flash_kernel(q_block, kv_block, bf16_exp)
    return pl.pallas_call(
        kernel,
        out_shape=jax.ShapeDtypeStruct((B, H, T, D), jnp.bfloat16),
        grid_spec=pltpu.PrefetchScalarGridSpec(
            num_scalar_prefetch=0,
            grid=grid,
            in_specs=[
                pl.BlockSpec((1, H, q_block, D), q_index),
                pl.BlockSpec((1, H, kv_block, D), kv_index),
                pl.BlockSpec((1, H, kv_block, D), kv_index),
            ],
            out_specs=pl.BlockSpec((1, H, q_block, D), q_index),
            scratch_shapes=[
                pltpu.VMEM((H, q_block), jnp.float32),       # running max m (de-padded)
                pltpu.VMEM((H, q_block), jnp.float32),       # running sum l (de-padded)
                pltpu.VMEM((H, q_block, D), jnp.float32),    # output accumulator
            ],
        ),
        compiler_params=_compiler_params(("parallel", "parallel", "arbitrary"), ws),
        cost_estimate=cost,
    )(q, k, v)


# ---------------------------------------------------------------------------
# Full module forward
# ---------------------------------------------------------------------------
def causal_self_attention(x, w_qkv, b_qkv, w_proj, b_proj, *, n_head,
                          q_block=None, kv_block=None, bf16_softmax_exp=False):
    """x: (B, T, C). Weights stored (in_features, out_features): y = x @ W + b."""
    B, T, C = x.shape
    assert C % n_head == 0
    H = n_head
    D = C // H
    out_dtype = x.dtype

    if q_block is None:
        q_block = min(T, 256)      # use 128 on v5e (16 MiB scoped-VMEM default)
    if kv_block is None:
        kv_block = min(T, 256)
    assert T % q_block == 0 and T % kv_block == 0

    # Fold the 1/sqrt(D) softmax scale into the Q columns of the fused qkv params.
    scale = 1.0 / math.sqrt(D)
    w_qkv_s = w_qkv.at[:, :C].multiply(scale).astype(jnp.bfloat16)    # (C, 3C)
    b_qkv_s = b_qkv.at[:C].multiply(scale).astype(jnp.float32).reshape(1, 3 * C)
    w_proj_b = w_proj.astype(jnp.bfloat16)                            # (C, C)
    b_proj_f = b_proj.astype(jnp.float32).reshape(1, C)

    # 1) fused QKV projection: one full-width (tile, C) @ (C, 3C) matmul pass.
    x2d = x.reshape(B * T, C).astype(jnp.bfloat16)
    qkv = _linear(x2d, w_qkv_s, b_qkv_s, jnp.bfloat16)                # (B*T, 3C)

    # 2) one-time layout plumbing to (B, H, T, D) for the head-batched kernel.
    qkv = qkv.reshape(B, T, 3, H, D)
    q = jnp.transpose(qkv[:, :, 0], (0, 2, 1, 3))
    k = jnp.transpose(qkv[:, :, 1], (0, 2, 1, 3))
    v = jnp.transpose(qkv[:, :, 2], (0, 2, 1, 3))

    # 3) causal flash attention (weight-free kernel).
    y_heads = _flash_attention(q, k, v, q_block=q_block, kv_block=kv_block,
                               bf16_exp=bf16_softmax_exp)             # (B, H, T, D)

    # 4) output projection: single (tile, C) @ (C, C) contraction.
    y2d = jnp.transpose(y_heads, (0, 2, 1, 3)).reshape(B * T, C)
    y = _linear(y2d, w_proj_b, b_proj_f, out_dtype)                   # (B*T, C)
    return y.reshape(B, T, C)


def reference(x, w_qkv, b_qkv, w_proj, b_proj, *, n_head):
    """Pure-JAX f32 reference mirroring the PyTorch forward."""
    B, T, C = x.shape
    D = C // n_head
    qkv = x @ w_qkv + b_qkv
    q, k, v = jnp.split(qkv, 3, axis=-1)

    def heads(t):
        return t.reshape(B, T, n_head, D).transpose(0, 2, 1, 3)

    q, k, v = heads(q), heads(k), heads(v)
    att = (q @ jnp.swapaxes(k, -2, -1)) * (1.0 / math.sqrt(D))
    mask = jnp.tril(jnp.ones((T, T), dtype=bool))
    att = jnp.where(mask[None, None], att, -jnp.inf)
    att = jax.nn.softmax(att, axis=-1)
    y = att @ v
    y = y.transpose(0, 2, 1, 3).reshape(B, T, C)
    return y @ w_proj + b_proj


if __name__ == "__main__":
    # Small config consistent with the module: B=2, T=8 (block_size), C=32, heads=4.
    B, T, C, n_head = 2, 8, 32, 4

    key = jax.random.PRNGKey(0)
    kx, k1, k2, k3, k4 = jax.random.split(key, 5)

    x = jax.random.normal(kx, (B, T, C), dtype=jnp.float32)
    w_qkv = jax.random.normal(k1, (C, 3 * C), dtype=jnp.float32) * 0.02
    b_qkv = jax.random.normal(k2, (3 * C,), dtype=jnp.float32) * 0.02
    w_proj = jax.random.normal(k3, (C, C), dtype=jnp.float32) * 0.02
    b_proj = jax.random.normal(k4, (C,), dtype=jnp.float32) * 0.02

    out = causal_self_attention(x, w_qkv, b_qkv, w_proj, b_proj, n_head=n_head)
    out = jax.block_until_ready(out)

    ref = reference(x, w_qkv, b_qkv, w_proj, b_proj, n_head=n_head)
    assert out.shape == (B, T, C)
    # bf16-class matmul precision (explicit design choice) -> loose tolerance
    max_err = float(jnp.max(jnp.abs(out - ref)))
    assert jnp.allclose(out, ref, atol=2e-2, rtol=2e-2), \
        f"mismatch vs reference (max abs err {max_err})"

    print("KERNEL_OK")
</pallas_src>

<mosaic_0001>
module attributes {stable_mosaic.version = 11 : i64} {
  func.func @_linear_kernel(%arg0: i32, %arg1: i32, %arg2: memref<16x32xbf16, #tpu.memory_space<vmem>>, %arg3: memref<32x96xbf16, #tpu.memory_space<vmem>>, %arg4: memref<1x96xf32, #tpu.memory_space<vmem>>, %arg5: memref<16x96xbf16, #tpu.memory_space<vmem>>) attributes {dimension_semantics = [#tpu.dimension_semantics<parallel>, #tpu.dimension_semantics<parallel>], iteration_bounds = array<i64: 1, 1>, scalar_prefetch = 0 : i64, scratch_operands = 0 : i64, tpu.core_type = #tpu.core_type<tc>, window_params = [{transform_indices = @transform_0, window_bounds = array<i64: 16, 32>}, {transform_indices = @transform_1, window_bounds = array<i64: 32, 96>}, {transform_indices = @transform_2, window_bounds = array<i64: 1, 96>}, {transform_indices = @transform_3, window_bounds = array<i64: 16, 96>}]} {
    %c0 = arith.constant 0 : index
    %c0_0 = arith.constant 0 : index
    %0 = vector.load %arg2[%c0, %c0_0] : memref<16x32xbf16, #tpu.memory_space<vmem>>, vector<16x32xbf16>
    %c0_1 = arith.constant 0 : index
    %c0_2 = arith.constant 0 : index
    %1 = vector.load %arg3[%c0_1, %c0_2] : memref<32x96xbf16, #tpu.memory_space<vmem>>, vector<32x96xbf16>
    %cst = arith.constant dense<0.000000e+00> : vector<16x96xf32>
    %2 = tpu.matmul %0, %1, %cst {dimension_numbers = #tpu.dot_dimension_numbers<[1], [0], [0], [1], [0, 0, 1, 1], [], []>} : vector<16x32xbf16>, vector<32x96xbf16>, vector<16x96xf32> -> vector<16x96xf32>
    %c0_3 = arith.constant 0 : index
    %c0_4 = arith.constant 0 : index
    %3 = vector.load %arg4[%c0_3, %c0_4] : memref<1x96xf32, #tpu.memory_space<vmem>>, vector<1x96xf32>
    %4 = vector.broadcast %3 : vector<1x96xf32> to vector<16x96xf32>
    %5 = arith.addf %2, %4 : vector<16x96xf32>
    %6 = arith.truncf %5 : vector<16x96xf32> to vector<16x96xbf16>
    %c0_5 = arith.constant 0 : index
    %c0_6 = arith.constant 0 : index
    %7 = vector.load %arg5[%c0_5, %c0_6] : memref<16x96xbf16, #tpu.memory_space<vmem>>, vector<16x96xbf16>
    tpu.vector_store %arg5[%c0_5, %c0_6], %6 {strides = array<i32>} : memref<16x96xbf16, #tpu.memory_space<vmem>>, vector<16x96xbf16>,
    return
  }
  func.func @transform_0(%arg0: i32, %arg1: i32) -> (i32, i32) {
    %c0_i32 = arith.constant 0 : i32
    %c0_i32_0 = arith.constant 0 : i32
    return %arg1, %c0_i32 : i32, i32
  }
  func.func @transform_1(%arg0: i32, %arg1: i32) -> (i32, i32) {
    %c0_i32 = arith.constant 0 : i32
    %c0_i32_0 = arith.constant 0 : i32
    return %c0_i32, %arg0 : i32, i32
  }
  func.func @transform_2(%arg0: i32, %arg1: i32) -> (i32, i32) {
    %c0_i32 = arith.constant 0 : i32
    %c0_i32_0 = arith.constant 0 : i32
    return %c0_i32, %arg0 : i32, i32
  }
  func.func @transform_3(%arg0: i32, %arg1: i32) -> (i32, i32) {
    %c0_i32 = arith.constant 0 : i32
    return %arg1, %arg0 : i32, i32
  }
}

</mosaic_0001>

<bundles_post_ra>
// kernel: tpu_custom_call.1
= control target key start
LH: loop header
LB: loop body
LE: loop exit
PB: predicated region body
PF: predicated region fallthrough
CT: control target
= control target key end

     0   :  { %8 = vsyncpa [#allocation3], 0  ;;  %s264_s0 = inlined_call_operand.hbm [shape: bf16[16,32], index: 0, kind: input, shape index: {}]   ;;  %s265_s1 = inlined_call_operand.hbm [shape: bf16[32,96], index: 1, kind: input, shape index: {}]   ;;  %s266_s2 = inlined_call_operand.vmem [shape: f32[1,96], index: 2, kind: input, shape index: {}]   ;;  %s267_s3 = inlined_call_operand.hbm [shape: bf16[16,96], index: 3, kind: output, shape index: {}]  }
   0x1   :  { %9 = vsyncpa [#allocation6], 0 }
   0x2   :  { %10 = vsyncpa [#allocation4], 0  ;;  %s15_s14 = sshll.u32 %s264_s0, 4  ;;  %s218_s15 = smov [#allocation2]   ;;  %s16_s14 = int_to_ptr.hbm [resolvable:$true] %s15_s14 }
   0x3   :  { %s17_s16 = sshll.u32 %s218_s15, 4  ;;  %s28_s19 = sshll.u32 %s265_s1, 4  ;;  %s18_s16 = int_to_ptr.vmem [resolvable:$true] %s17_s16  ;;  %s29_s19 = int_to_ptr.hbm [resolvable:$true] %s28_s19 }
   0x4   :  { %s219_s20 = smov 64   ;;  %s220_s21 = smov 4  }
   0x5   :  { %23 = dma.hbm_to_vmem [thread:$0]  %s16_s14, 128, %s18_s16, [#allocation3], %s219_s20, %s219_s20, %s220_s21  }
   0x6   :  { %s221_s22 = smov [#allocation5]  }
   0x7   :  { %s30_s23 = sshll.u32 %s221_s22, 4  ;;  %s31_s23 = int_to_ptr.vmem [resolvable:$true] %s30_s23 }
   0x8   :  { %36 = dma.hbm_to_vmem [thread:$0]  %s29_s19, 256, %s31_s23, [#allocation6], %s219_s20, %s219_s20, %s220_s21  }
   0x9   :  { %212 = dma.done.wait [#allocation3], 128  }
   0xa   :  { %213 = vsyncadd [#allocation3], 4294967168 }
   0xb   :  { %214 = dma.done.wait [#allocation6], 256  }
   0xc   :  { %215 = vsyncadd [#allocation6], 4294967040  ;;  %v133_v0 = vld [vmem:[#allocation5 + $0x8] sm:$0xff]  ;;  %v132_v1 = vld [vmem:[#allocation5] sm:$0xff]  ;;  %vm75_vm0 = vcmask 261120   ;;  %vm95_vm1 = vcmask 781312  }
   0xd   :  { %85 = vmatpush.bf16.msra.mxu0 %v133_v0  ;;  %v131_v2 = vld [vmem:[#allocation2] sm:$0xff]  ;;  %s222_s24 = smov [#allocation7]   ;;  %s104_s28 = sshll.u32 %s267_s3, 4  ;;  %s105_s28 = int_to_ptr.hbm [resolvable:$true] %s104_s28 }
   0xe   :  { %v139_v3 = vld [vmem:[%s266_s2] ss:$0 sm:$0xff]  ;;  %s102_s25 = sshll.u32 %s222_s24, 4  ;;  %s103_s25 = int_to_ptr.vmem [resolvable:$true] %s102_s25 }
  0x11   :  { %86 = vmatpush.bf16.msra.mxu0 %v132_v1 }
  0x14   :  { %130 = vmatmul.msk.bf16.vlgmr.msra.gmra.mxu0 %vm75_vm0, %v131_v2 }
  0x91   :  { %v88_v4 = vpop.f32.mrf.mxu0 }
  0x92   :  { %v89_v5 = vadd.f32 %v139_v3, %v88_v4 }
  0x94   :  { %v93_v6 = vpack.c.bf16 %v89_v5, %v89_v5 }
  0x96   :  { %96 = vst.msk [vmem:[#allocation7] sm:$0xf] %vm95_vm1, %v93_v6 }
  0x99   :  { %v90_v7 = vpop.f32.mrf.mxu0 }
  0x9a   :  { %v91_v8 = vadd.f32 %v139_v3, %v90_v7 }
  0x9c   :  { %v94_v9 = vpack.c.bf16 %v91_v8, %v91_v8 }
  0x9e   :  { %97 = vst.msk [vmem:[#allocation7 + $0x4] sm:$0xf] %vm95_vm1, %v94_v9 }
  0x9f   :  { %110 = dma.vmem_to_hbm [thread:$0]  %s103_s25, 128, %s105_s28, [#allocation4], %s219_s20, %s219_s20, %s220_s21  }
  0xa0   :  { %216 = dma.done.wait [#allocation4], 128  }
  0xa1   :  { %217 = vsyncadd [#allocation4], 4294967168 }
  0xa2   :  { %115 = vsyncpa [#allocation3], 1 }
  0xa3   :  { %116 = vsyncpa [#allocation6], 1 }
  0xa4   :  { %117 = vsyncpa [#allocation4], 1 }

</bundles_post_ra>
